<compile_context>
chip_gen: v5e
topology: v5e:2x2
jax: 0.10.0
libtpu: 0.0.40
codegen_flags: <defaults>
</compile_context>

<pallas_src>
import functools

import jax
import jax.numpy as jnp
from jax import lax
from jax.experimental import pallas as pl
from jax.experimental.pallas import tpu as pltpu


# --------------------------------------------------------------------------
# Kernel
# --------------------------------------------------------------------------
def _mlp_kernel(x_ref, w1_ref, b1_ref, w2_ref, b2_ref, o_ref, *, precision):
    # Linear 1 on the MXU, f32 accumulation: (TB, obs) @ (obs, hidden).
    h = jnp.dot(x_ref[...], w1_ref[...],
                preferred_element_type=jnp.float32, precision=precision)
    # Bias add + ReLU on the VPU, kept in f32 (v5e has no bf16 VPU path).
    h = jnp.maximum(h + b1_ref[...], 0.0)
    # Linear 2 on the MXU: cast activation to the weight compute dtype so the
    # MXU runs at bf16 rate when bf16 params are used; accumulate in f32.
    out = jnp.dot(h.astype(w2_ref.dtype), w2_ref[...],
                  preferred_element_type=jnp.float32, precision=precision)
    # Narrow (TB, 8) f32 store: masked vst, but 16x less HBM writeback than
    # the previous 128-lane padding.
    o_ref[...] = (out + b2_ref[...]).astype(o_ref.dtype)


# --------------------------------------------------------------------------
# One-time parameter preparation (hoisted out of the forward path)
# --------------------------------------------------------------------------
def prepare_params(w1, b1, w2, b2, compute_dtype=jnp.bfloat16):
    """Convert PyTorch-layout Linear params to the kernel layout, once.

    Args (PyTorch nn.Linear layout):
      w1: (hidden, obs)        b1: (hidden,)
      w2: (n_actions, hidden)  b2: (n_actions,)
    Returns a dict of kernel-ready arrays:
      w1_t : (obs, hidden)   compute_dtype
      b1   : (1, hidden)     float32
      w2_p : (hidden, n_pad) compute_dtype, zero-padded columns (n_pad = 8 here)
      b2_p : (1, n_pad)      float32, zero-padded
      n_actions : python int (for the final slice)
      precision : matmul precision for the kernel (HIGHEST for pure-f32 parity)
    """
    hidden, obs = w1.shape
    n_actions = w2.shape[0]
    # Pad the action dim only up to the next multiple of 8 (not 128): the
    # block's last dim equals the full array dim so this stays legal, and the
    # f32 output writeback is 16x smaller than 128-lane padding.
    n_pad = max(8, ((n_actions + 7) // 8) * 8)

    w1_t = jnp.transpose(w1).astype(compute_dtype)            # (obs, hidden)
    b1_r = b1.reshape(1, hidden).astype(jnp.float32)

    w2_t = jnp.transpose(w2).astype(jnp.float32)               # (hidden, n_act)
    w2_p = jnp.zeros((hidden, n_pad), jnp.float32).at[:, :n_actions].set(w2_t)
    w2_p = w2_p.astype(compute_dtype)
    b2_p = jnp.zeros((1, n_pad), jnp.float32).at[:, :n_actions].set(
        b2.reshape(1, n_actions).astype(jnp.float32))

    # Pure-f32 params -> exact f32 MXU passes (PyTorch parity); bf16 params ->
    # default (full-rate bf16) precision.
    precision = (lax.Precision.HIGHEST
                 if jnp.dtype(compute_dtype) == jnp.dtype(jnp.float32)
                 else None)

    return dict(w1_t=w1_t, b1=b1_r, w2_p=w2_p, b2_p=b2_p,
                n_actions=n_actions, precision=precision)


# --------------------------------------------------------------------------
# Batch tiling policy
# --------------------------------------------------------------------------
def _choose_batch_tile(batch, block_batch, min_split):
    """Pick the per-grid-step batch tile.

    * batch > block_batch : fixed block_batch tiles (multiple of 8), ragged
      tail padded.
    * moderately large batch that splits cleanly : two tiles (each a multiple
      of 8, no padding) so the "parallel" axis can use both v7x TensorCores.
    * otherwise : one full-batch tile (legal for any batch size, no padding).
    """
    if batch > block_batch:
        return block_batch
    if batch % 16 == 0 and batch // 2 >= min_split:
        return batch // 2
    return batch


# --------------------------------------------------------------------------
# Forward pass
# --------------------------------------------------------------------------
def net_forward(x, params, *, block_batch=4096, min_split=512):
    """Forward pass of Net.  x: (batch, obs_size) -> (batch, n_actions) f32."""
    w1_t, b1_r = params["w1_t"], params["b1"]
    w2_p, b2_p = params["w2_p"], params["b2_p"]
    n_actions = params["n_actions"]
    precision = params["precision"]

    obs_size, hidden = w1_t.shape
    n_pad = w2_p.shape[1]
    batch = x.shape[0]

    # Keep block_batch a multiple of 8 (sublane constraint for partial tiles).
    block_batch = max(8, block_batch - (block_batch % 8))

    # Cast the activation stream to the compute dtype (bf16 halves HBM bytes
    # for the only batch-scaled input; fuses with the producer under jit).
    x = x.astype(w1_t.dtype)

    tb = _choose_batch_tile(batch, block_batch, min_split)
    num_tiles = pl.cdiv(batch, tb)
    padded_batch = num_tiles * tb
    if padded_batch != batch:
        # Only reachable for very large batches with a ragged tail; the common
        # (small-batch RL) path never materializes a padded copy of x.
        x = jnp.pad(x, ((0, padded_batch - batch), (0, 0)))

    const_map = lambda i: (0, 0)
    # Weights/biases are revisited with the same block index every step:
    # single-buffer them (no extra VMEM buffer / startup DMA descriptor).
    resident = dict(pipeline_mode=pl.Buffered(1))

    out = pl.pallas_call(
        functools.partial(_mlp_kernel, precision=precision),
        out_shape=jax.ShapeDtypeStruct((padded_batch, n_pad), jnp.float32),
        grid=(num_tiles,),
        in_specs=[
            # x streams through per batch tile.
            pl.BlockSpec((tb, obs_size), lambda i: (i, 0)),
            # Weights / biases: constant index_map -> DMA'd once, VMEM-resident.
            pl.BlockSpec((obs_size, hidden), const_map, **resident),
            pl.BlockSpec((1, hidden), const_map, **resident),
            pl.BlockSpec((hidden, n_pad), const_map, **resident),
            pl.BlockSpec((1, n_pad), const_map, **resident),
        ],
        # Narrow (TB, 8) f32 output tile: 16x less HBM writeback per row.
        out_specs=pl.BlockSpec((tb, n_pad), lambda i: (i, 0)),
        compiler_params=pltpu.CompilerParams(
            dimension_semantics=("parallel",)),
    )(x, w1_t, b1_r, w2_p, b2_p)

    # Slice away lane padding (and any batch padding).
    return out[:batch, :n_actions]


# --------------------------------------------------------------------------
# Reference (mirrors the kernel's cast points; exact-f32 matmuls)
# --------------------------------------------------------------------------
def reference_forward(x, w1, b1, w2, b2, compute_dtype=jnp.float32):
    f32 = jnp.float32
    hp = lax.Precision.HIGHEST
    xc = x.astype(compute_dtype).astype(f32)
    w1c = w1.astype(compute_dtype).astype(f32)
    w2c = w2.astype(compute_dtype).astype(f32)
    h = jnp.maximum(jnp.dot(xc, w1c.T, precision=hp) + b1.astype(f32), 0.0)
    h = h.astype(compute_dtype).astype(f32)
    return jnp.dot(h, w2c.T, precision=hp) + b2.astype(f32)


# --------------------------------------------------------------------------
# Self-test
# --------------------------------------------------------------------------
if __name__ == "__main__":
    # FrozenLake-4x4 dimensions from the original script:
    #   obs_size = 16 (one-hot state), hidden_size = 128, n_actions = 4
    obs_size, hidden_size, n_actions = 16, 128, 4
    batch = 21  # deliberately NOT a multiple of 8 (tests the no-pad full tile)

    key = jax.random.PRNGKey(0)
    kx, kx2, k1, k2, k3, k4 = jax.random.split(key, 6)

    # Deterministic synthetic parameters (PyTorch-Linear-like uniform init).
    bound1 = 1.0 / (obs_size ** 0.5)
    bound2 = 1.0 / (hidden_size ** 0.5)
    w1 = jax.random.uniform(k1, (hidden_size, obs_size), jnp.float32,
                            -bound1, bound1)
    b1 = jax.random.uniform(k2, (hidden_size,), jnp.float32, -bound1, bound1)
    w2 = jax.random.uniform(k3, (n_actions, hidden_size), jnp.float32,
                            -bound2, bound2)
    b2 = jax.random.uniform(k4, (n_actions,), jnp.float32, -bound2, bound2)
    x = jax.random.uniform(kx, (batch, obs_size), jnp.float32)
    x32 = jax.random.uniform(kx2, (32, obs_size), jnp.float32)

    # --- bf16 compute path, multi-tile grid with a ragged tail
    #     (block_batch=8 -> 3 tiles, batch padded 21 -> 24). ---
    params_bf16 = prepare_params(w1, b1, w2, b2, compute_dtype=jnp.bfloat16)
    fwd_bf16 = jax.jit(lambda xb: net_forward(xb, params_bf16, block_batch=8))
    out_bf16 = jax.block_until_ready(fwd_bf16(x))
    ref_bf16 = reference_forward(x, w1, b1, w2, b2, jnp.bfloat16)
    assert out_bf16.shape == (batch, n_actions)
    assert jnp.allclose(out_bf16, ref_bf16, atol=1e-3, rtol=1e-3)

    # --- bf16 path, clean two-tile split (exercises the v7x two-core path,
    #     no padding: batch=32 -> 2 tiles of 16). ---
    fwd_split = jax.jit(lambda xb: net_forward(xb, params_bf16, min_split=8))
    out_split = jax.block_until_ready(fwd_split(x32))
    ref_split = reference_forward(x32, w1, b1, w2, b2, jnp.bfloat16)
    assert out_split.shape == (32, n_actions)
    assert jnp.allclose(out_split, ref_split, atol=1e-3, rtol=1e-3)

    # --- full f32 path (single full-batch tile, no padding, HIGHEST-precision
    #     MXU passes): matches the PyTorch module's numerics. ---
    params_f32 = prepare_params(w1, b1, w2, b2, compute_dtype=jnp.float32)
    fwd_f32 = jax.jit(lambda xb: net_forward(xb, params_f32))
    out_f32 = jax.block_until_ready(fwd_f32(x))
    ref_f32 = reference_forward(x, w1, b1, w2, b2, jnp.float32)
    assert out_f32.shape == (batch, n_actions)
    assert jnp.allclose(out_f32, ref_f32, atol=1e-5, rtol=1e-5)

    print("KERNEL_OK")
</pallas_src>

<mosaic_0001>
module attributes {stable_mosaic.version = 11 : i64} {
  func.func @_mlp_kernel(%arg0: i32, %arg1: memref<8x16xbf16, #tpu.memory_space<vmem>>, %arg2: memref<16x128xbf16, #tpu.memory_space<vmem>>, %arg3: memref<1x128xf32, #tpu.memory_space<vmem>>, %arg4: memref<128x8xbf16, #tpu.memory_space<vmem>>, %arg5: memref<1x8xf32, #tpu.memory_space<vmem>>, %arg6: memref<8x8xf32, #tpu.memory_space<vmem>>) attributes {dimension_semantics = [#tpu.dimension_semantics<parallel>], iteration_bounds = array<i64: 3>, scalar_prefetch = 0 : i64, scratch_operands = 0 : i64, tpu.core_type = #tpu.core_type<tc>, window_params = [{transform_indices = @transform_0, window_bounds = array<i64: 8, 16>}, {pipeline_mode = #tpu.pipeline_mode<synchronous>, transform_indices = @transform_1, window_bounds = array<i64: 16, 128>}, {pipeline_mode = #tpu.pipeline_mode<synchronous>, transform_indices = @transform_2, window_bounds = array<i64: 1, 128>}, {pipeline_mode = #tpu.pipeline_mode<synchronous>, transform_indices = @transform_3, window_bounds = array<i64: 128, 8>}, {pipeline_mode = #tpu.pipeline_mode<synchronous>, transform_indices = @transform_4, window_bounds = array<i64: 1, 8>}, {transform_indices = @transform_5, window_bounds = array<i64: 8, 8>}]} {
    %c0 = arith.constant 0 : index
    %c0_0 = arith.constant 0 : index
    %0 = vector.load %arg1[%c0, %c0_0] : memref<8x16xbf16, #tpu.memory_space<vmem>>, vector<8x16xbf16>
    %c0_1 = arith.constant 0 : index
    %c0_2 = arith.constant 0 : index
    %1 = vector.load %arg2[%c0_1, %c0_2] : memref<16x128xbf16, #tpu.memory_space<vmem>>, vector<16x128xbf16>
    %cst = arith.constant dense<0.000000e+00> : vector<8x128xf32>
    %2 = tpu.matmul %0, %1, %cst {dimension_numbers = #tpu.dot_dimension_numbers<[1], [0], [0], [1], [0, 0, 1, 1], [], []>} : vector<8x16xbf16>, vector<16x128xbf16>, vector<8x128xf32> -> vector<8x128xf32>
    %c0_3 = arith.constant 0 : index
    %c0_4 = arith.constant 0 : index
    %3 = vector.load %arg3[%c0_3, %c0_4] : memref<1x128xf32, #tpu.memory_space<vmem>>, vector<1x128xf32>
    %4 = vector.broadcast %3 : vector<1x128xf32> to vector<8x128xf32>
    %5 = arith.addf %2, %4 : vector<8x128xf32>
    %cst_5 = arith.constant 0.000000e+00 : f32
    %6 = vector.broadcast %cst_5 : f32 to vector<8x128xf32>
    %7 = arith.maximumf %5, %6 : vector<8x128xf32>
    %8 = arith.truncf %7 : vector<8x128xf32> to vector<8x128xbf16>
    %c0_6 = arith.constant 0 : index
    %c0_7 = arith.constant 0 : index
    %9 = vector.load %arg4[%c0_6, %c0_7] : memref<128x8xbf16, #tpu.memory_space<vmem>>, vector<128x8xbf16>
    %cst_8 = arith.constant dense<0.000000e+00> : vector<8x8xf32>
    %10 = tpu.matmul %8, %9, %cst_8 {dimension_numbers = #tpu.dot_dimension_numbers<[1], [0], [0], [1], [0, 0, 1, 1], [], []>} : vector<8x128xbf16>, vector<128x8xbf16>, vector<8x8xf32> -> vector<8x8xf32>
    %c0_9 = arith.constant 0 : index
    %c0_10 = arith.constant 0 : index
    %11 = vector.load %arg5[%c0_9, %c0_10] : memref<1x8xf32, #tpu.memory_space<vmem>>, vector<1x8xf32>
    %12 = vector.broadcast %11 : vector<1x8xf32> to vector<8x8xf32>
    %13 = arith.addf %10, %12 : vector<8x8xf32>
    %c0_11 = arith.constant 0 : index
    %c0_12 = arith.constant 0 : index
    %14 = vector.load %arg6[%c0_11, %c0_12] : memref<8x8xf32, #tpu.memory_space<vmem>>, vector<8x8xf32>
    tpu.vector_store %arg6[%c0_11, %c0_12], %13 {strides = array<i32>} : memref<8x8xf32, #tpu.memory_space<vmem>>, vector<8x8xf32>,
    return
  }
  func.func @transform_0(%arg0: i32) -> (i32, i32) {
    %c0_i32 = arith.constant 0 : i32
    %c0_i32_0 = arith.constant 0 : i32
    return %arg0, %c0_i32 : i32, i32
  }
  func.func @transform_1(%arg0: i32) -> (i32, i32) {
    %c0_i32 = arith.constant 0 : i32
    %c0_i32_0 = arith.constant 0 : i32
    %c0_i32_1 = arith.constant 0 : i32
    return %c0_i32, %c0_i32_0 : i32, i32
  }
  func.func @transform_2(%arg0: i32) -> (i32, i32) {
    %c0_i32 = arith.constant 0 : i32
    %c0_i32_0 = arith.constant 0 : i32
    %c0_i32_1 = arith.constant 0 : i32
    return %c0_i32, %c0_i32_0 : i32, i32
  }
  func.func @transform_3(%arg0: i32) -> (i32, i32) {
    %c0_i32 = arith.constant 0 : i32
    %c0_i32_0 = arith.constant 0 : i32
    %c0_i32_1 = arith.constant 0 : i32
    return %c0_i32, %c0_i32_0 : i32, i32
  }
  func.func @transform_4(%arg0: i32) -> (i32, i32) {
    %c0_i32 = arith.constant 0 : i32
    %c0_i32_0 = arith.constant 0 : i32
    %c0_i32_1 = arith.constant 0 : i32
    return %c0_i32, %c0_i32_0 : i32, i32
  }
  func.func @transform_5(%arg0: i32) -> (i32, i32) {
    %c0_i32 = arith.constant 0 : i32
    %c0_i32_0 = arith.constant 0 : i32
    return %arg0, %c0_i32 : i32, i32
  }
}

</mosaic_0001>

<bundles_post_ra>
// kernel: _lambda_.1
= control target key start
LH: loop header
LB: loop body
LE: loop exit
PB: predicated region body
PF: predicated region fallthrough
CT: control target
= control target key end

     0   :  { %10 = vsyncpa [#allocation3], 0  ;;  %s573_s18 = smov 0   ;;  %s627_s0 = inlined_call_operand.vmem [shape: bf16[24,16], index: 0, kind: input, shape index: {}]   ;;  %s628_s1 = inlined_call_operand.hbm [shape: bf16[16,128], index: 1, kind: input, shape index: {}]   ;;  %s629_s2 = inlined_call_operand.vmem [shape: f32[1,128], index: 2, kind: input, shape index: {}]   ;;  %s630_s3 = inlined_call_operand.vmem [shape: bf16[128,8], index: 3, kind: input, shape index: {}]   ;;  %s631_s4 = inlined_call_operand.vmem [shape: f32[1,8], index: 4, kind: input, shape index: {}]   ;;  %s632_s5 = inlined_call_operand.vmem [shape: f32[24,8], index: 5, kind: output, shape index: {}]  }
   0x1 LB: > { %s168_s21 = sshll.u32 %s628_s1, 4  ;;  %s418_s22 = sadd.s32 4294967295, %s538_s18   ;;  %s538_s18 = sphi %s573_s18, %s16_s18   ;;  %s169_s21 = int_to_ptr.hbm [resolvable:$true] %s168_s21 }
   0x2   : > { %p420_p0 = scmp.ge.s32.totalorder %s538_s18, 1  ;;  %p157_p1 = scmp.lt.s32.totalorder %s538_s18, 4 }
   0x3   : > { %p483_p2 = scmp.eq.s32.totalorder %s418_s22, 0  ;;  %s540_s23 = smov [#allocation2]  }
   0x4   : > { %p158_p3 = pnand %p420_p0, %p157_p1  ;;  %s170_s24 = sshll.u32 %s540_s23, 4  ;;  %s171_s24 = int_to_ptr.vmem [resolvable:$true] %s170_s24 }
   0x5   : > { %s541_s25 = smov 64   ;;  %s542_s26 = smov 4  }
   0x6   : > { %p479_p4 = pneg %p158_p3  ;;  %202 = sbr.rel (%p158_p3) target bundleno = 284 (0x11c), region = 40 }
   0x8   : > { %p480_p5 = pnand %p483_p2, %p479_p4 }
   0xa   : > { %482 = dma.hbm_to_vmem [thread:$0]  (!%p480_p5), %s169_s21, 128, %s171_s24, [#allocation3], %s541_s25, %s541_s25, %s542_s26  }
   0xb   : > { %533 = dma.done.wait (%p483_p2), [#allocation3], 128  }
   0xc   : > { %535 = vsyncadd (%p483_p2), [#allocation3], 4294967168  ;;  %p229_p6 = scmp.lt.s32.totalorder %s418_s22, 2  ;;  %v466_v0 = vld [vmem:[#allocation2] sm:$0xff]  ;;  %v474_v1 = vld [vmem:[%s630_s3 + $0x38] sm:$0xff]  ;;  %vm251_vm0 = vcmask 130048  }
   0xd   : > { %262 = vmatpush.bf16.msra.mxu0 %v466_v0  ;;  %338 = vmatpush.bf16.msra.mxu1 %v474_v1  ;;  %v473_v3 = vld [vmem:[%s630_s3 + $0x30] sm:$0xff]  ;;  %v472_v4 = vld [vmem:[%s630_s3 + $0x28] sm:$0xff]  ;;  %v471_v5 = vld [vmem:[%s630_s3 + $0x20] sm:$0xff]  ;;  %vm351_vm1 = vcmask 64512  }
   0xe   : > { %s634_s22 = smov (!%p229_p6, %s418_s22), 2  ;;  %v470_v6 = vld [vmem:[%s630_s3 + $0x18] sm:$0xff]  ;;  %v469_v7 = vld [vmem:[%s630_s3 + $0x10] sm:$0xff]  ;;  %v468_v8 = vld [vmem:[%s630_s3 + $0x8] sm:$0xff] }
   0xf   : > { %s425_s27 = sshll.u32 %s634_s22, 2  ;;  %v467_v9 = vld [vmem:[%s630_s3] sm:$0xff]  ;;  %s426_s26 = sshll.u32 %s634_s22, 3 }
  0x10   : > { %s232_s30 = scalar_lea.vmem %s627_s0, %s425_s27  ;;  %v496_v10 = vld [vmem:[%s629_s2] ss:$0 sm:$0xff]  ;;  %s236_s6 = scalar_lea.vmem %s632_s5, %s426_s26 }
  0x11   : > { %v238_v2 = vld [vmem:[%s232_s30] sm:$0xf]  ;;  %339 = vmatpush.bf16.msra.mxu1 %v473_v3 }
  0x12   : > { %431 = vmatmul.msk.bf16.vlgmr.msra.gmra.mxu0 %vm251_vm0, %v238_v2  ;;  %v497_v16 = vld [vmem:[%s631_s4] ss:$0 sm:$0xff] }
  0x15   : > { %340 = vmatpush.bf16.msra.mxu1 %v472_v4 }
  0x19   : > { %341 = vmatpush.bf16.msra.mxu1 %v471_v5 }
  0x1d   : > { %342 = vmatpush.bf16.msra.mxu1 %v470_v6 }
  0x21   : > { %343 = vmatpush.bf16.msra.mxu1 %v469_v7 }
  0x25   : > { %344 = vmatpush.bf16.msra.mxu1 %v468_v8 }
  0x29   : > { %345 = vmatpush.bf16.msra.mxu1 %v467_v9 }
  0x8f   : > { %v264_v11 = vpop.f32.mrf.mxu0 }
  0x90   : > { %v265_v12 = vadd.f32 %v496_v10, %v264_v11 }
  0x92   : > { %v268_v13 = vmax.f32 %v265_v12, 0.0 }
  0x94   : > { %v269_v14 = vpack.c.bf16 %v268_v13, %v268_v13 }
  0x96   : > { %346 = vmatmul.bf16.vlgmr.msra.gmra.mxu1 %v269_v14 }
  0x97   : > { %v266_v15 = vpop.f32.mrf.mxu0 }
 0x113   : > { %v347_v17 = vpop.f32.mrf.mxu1 }
 0x114   : > { %v348_v18 = vadd.f32 %v497_v16, %v347_v17 }
 0x116   : > { %352 = vst.msk [vmem:[%s236_s6] sm:$0xff] %vm351_vm1, %v348_v18 }
 0x11b   : > { %v349_v19 = vpop.f32.mrf.mxu1 }
 0x11c PF: > { %s16_s18 = sadd.s32 1, %s538_s18  }
 0x11d   : > { %p13_p7 = scmp.ge.s32.totalorder %s16_s18, 5  }
 0x11f   :  { %15 = sbr.rel (!%p13_p7) target bundleno = 1 (0x1), region = 75 }
 0x124   :  { %372 = vsyncpa [#allocation3], 1 }
 0x125   :  { %374 = vsyncpa [#allocation3 + $0x1], 1 }

</bundles_post_ra>
